<compile_context>
chip_gen: v7x
topology: tpu7x:2x2x1
jax: 0.10.0
libtpu: 0.0.40
codegen_flags: <defaults>
</compile_context>

<pallas_src>
import math

import jax
import jax.numpy as jnp
from jax.experimental import pallas as pl
from jax.experimental.pallas import tpu as pltpu


def _make_gcn_kernel(tk, x_resident):
    """adj @ support accumulated into the resident f32 output block.

    adj_ref: (tn, tk)                 compute_dtype
    s_ref:   (N, HFc) if x_resident else (tk, HFc)   compute_dtype
    b_ref:   (1, HFc)                 f32
    o_ref:   (tn, HFc)                f32 (VMEM-resident across the k axis)
    """

    def kernel(adj_ref, s_ref, b_ref, o_ref):
        k = pl.program_id(2)

        @pl.when(k == 0)
        def _init():
            o_ref[...] = jnp.zeros_like(o_ref)

        if x_resident:
            start = pl.multiple_of(k * tk, tk)
            s_tile = s_ref[pl.ds(start, tk), :]
        else:
            s_tile = s_ref[...]

        o_ref[...] += jnp.dot(adj_ref[...], s_tile,
                              preferred_element_type=jnp.float32)

        @pl.when(k == pl.num_programs(2) - 1)
        def _finalize():
            o_ref[...] = o_ref[...] + b_ref[...]

    return kernel


def _pick_tile(n, target, mult):
    """Largest divisor of n that is <= target and a multiple of `mult`;
    falls back to the full dimension (always legal)."""
    if n <= target:
        return n
    t = target - (target % mult)
    while t >= mult:
        if n % t == 0:
            return t
        t -= mult
    return n


def _tpu_vmem_capacity():
    try:
        info = pltpu.get_tpu_info()
        cap = getattr(info, "vmem_capacity_bytes", None)
        if cap:
            return int(cap)
    except Exception:
        pass
    return 64 * 1024 * 1024  # conservative fallback (v7x per-core VMEM)


def graph_convolution(inputs, adj, weight, bias=None, *,
                      compute_dtype=jnp.bfloat16,
                      row_tile=None, k_tile=None, x_resident=None):
    """Pallas TPU GraphConvolution forward.

    inputs: (B, H, N, Fin) f32
    adj:    (B, N, N)      f32
    weight: (Fin, Fout)    f32
    bias:   (Fout,) f32 or None
    returns (B, H, N, Fout) f32
    """
    B, H, N, Fin = inputs.shape
    Fout = weight.shape[-1]
    HF = H * Fout
    HFc = ((HF + 127) // 128) * 128            # lane-dense (pad to multiple of 128)

    if bias is None:
        bias = jnp.zeros((Fout,), jnp.float32)

    # --- wrapper-side projection + layout plumbing ----------------------------
    # support_f[b, n, h*Fout + o] = sum_f inputs[b,h,n,f] * weight[f,o]
    support_f = jnp.einsum("bhnf,fo->bnho", inputs, weight,
                           precision=jax.lax.Precision.HIGHEST).reshape(B, N, HF)
    if HFc > HF:
        support_f = jnp.pad(support_f, ((0, 0), (0, 0), (0, HFc - HF)))
    bias_f = jnp.pad(jnp.tile(bias.astype(jnp.float32), H),
                     (0, HFc - HF)).reshape(1, HFc)

    # bf16 MXU / HBM traffic (optional), f32 accumulation inside the kernel.
    support_c = support_f.astype(compute_dtype)
    adj_c = adj.astype(compute_dtype)
    itemsize = jnp.dtype(compute_dtype).itemsize

    # --- generation-aware tiling & VMEM budgeting ------------------------------
    vmem_cap = _tpu_vmem_capacity()
    vmem_limit = min(int(vmem_cap * 3 // 4), 100 * 1024 * 1024)   # ~48 MiB on v7x
    big_vmem = vmem_cap >= 96 * 1024 * 1024
    tn_target = 512 if big_vmem else 256
    tk_target = 1024 if big_vmem else 512

    tn = row_tile if row_tile is not None else _pick_tile(N, tn_target, 8)
    tk = k_tile if k_tile is not None else _pick_tile(N, tk_target, 128)

    def _working_set(tn_, tk_, res_):
        adj_b = 2 * tn_ * tk_ * itemsize                      # double-buffered adj tiles
        sup_b = 2 * (N if res_ else tk_) * HFc * itemsize     # support (resident or tiled)
        out_b = 2 * tn_ * HFc * 4                             # f32 output block
        return adj_b + sup_b + out_b + 2 * HFc * 4            # + bias

    budget = int(vmem_limit * 0.9)
    if x_resident is None:
        resident = 2 * N * HFc * itemsize <= budget // 3
    else:
        resident = bool(x_resident)

    # Shrink tn first (keeps the lane axis long), then tk, then drop residency.
    while _working_set(tn, tk, resident) > budget:
        new_tn = _pick_tile(N, max(8, tn // 2), 8)
        new_tk = _pick_tile(N, max(128, tk // 2), 128)
        if new_tn < tn:
            tn = new_tn
        elif new_tk < tk:
            tk = new_tk
        elif resident and x_resident is None:
            resident = False
        else:
            break

    assert N % tn == 0 and N % tk == 0, "tiles must divide N"
    grid = (B, N // tn, N // tk)

    # --- cost estimate (advisory) ----------------------------------------------
    sup_reads = 1 if resident else (N + tn - 1) // tn
    flops = 2 * B * N * N * HFc
    bytes_accessed = int(B * N * N * itemsize                 # adj streamed once
                         + sup_reads * B * N * HFc * itemsize  # support
                         + B * N * HFc * 4                     # output
                         + HFc * 4)                            # bias

    support_spec = (
        pl.BlockSpec((pl.Squeezed(), N, HFc), lambda b, i, k: (b, 0, 0))
        if resident else
        pl.BlockSpec((pl.Squeezed(), tk, HFc), lambda b, i, k: (b, k, 0))
    )

    out_f = pl.pallas_call(
        _make_gcn_kernel(tk, resident),
        out_shape=jax.ShapeDtypeStruct((B, N, HFc), jnp.float32),
        grid_spec=pltpu.PrefetchScalarGridSpec(
            num_scalar_prefetch=0,
            grid=grid,
            in_specs=[
                # adj[b, i*tn:(i+1)*tn, k*tk:(k+1)*tk]
                pl.BlockSpec((pl.Squeezed(), tn, tk), lambda b, i, k: (b, i, k)),
                # pre-projected support (resident per batch, or tiled over k)
                support_spec,
                # tiled+padded bias (resident, tiny)
                pl.BlockSpec((1, HFc), lambda b, i, k: (0, 0)),
            ],
            out_specs=pl.BlockSpec((pl.Squeezed(), tn, HFc),
                                   lambda b, i, k: (b, i, 0)),
        ),
        compiler_params=pltpu.CompilerParams(
            dimension_semantics=("parallel", "parallel", "arbitrary"),
            vmem_limit_bytes=vmem_limit,
        ),
        cost_estimate=pl.CostEstimate(
            flops=flops, transcendentals=0, bytes_accessed=bytes_accessed),
    )(adj_c, support_c, bias_f)

    # unfold: (B, N, HFc) -> slice padding -> (B, H, N, Fout)
    return out_f[:, :, :HF].reshape(B, N, H, Fout).transpose(0, 2, 1, 3)


def init_params(key, in_features, out_features):
    # Xavier uniform (gain=1), matching nn.init.xavier_uniform_ for a 2-D weight.
    bound = math.sqrt(6.0 / (in_features + out_features))
    weight = jax.random.uniform(
        key, (in_features, out_features), jnp.float32, -bound, bound
    )
    bias = jnp.zeros((out_features,), jnp.float32)
    return weight, bias


def _reference(inputs, adj, weight, bias):
    support = jnp.matmul(inputs, weight)                       # (B,H,N,Fout)
    return jnp.matmul(adj[:, None, :, :], support) + bias      # (B,H,N,Fout)


if __name__ == "__main__":
    B, H, N = 2, 4, 16
    Fin, Fout = 8, 32        # H*Fout = 128 -> already lane-dense

    key = jax.random.PRNGKey(0)
    k_x, k_adj, k_w, k_w2 = jax.random.split(key, 4)

    inputs = jax.random.normal(k_x, (B, H, N, Fin), jnp.float32)
    adj_raw = jax.random.uniform(k_adj, (B, N, N), jnp.float32)
    # row-normalized adjacency (typical GCN preprocessing; any (B,N,N) works)
    adj = adj_raw / jnp.sum(adj_raw, axis=-1, keepdims=True)

    weight, bias = init_params(k_w, Fin, Fout)
    out_ref = _reference(inputs, adj, weight, bias)

    # f32 MXU path (resident support)
    out_f32 = jax.block_until_ready(
        graph_convolution(inputs, adj, weight, bias, compute_dtype=jnp.float32))
    # default bf16 MXU-input path with f32 accumulation
    out_bf16 = jax.block_until_ready(
        graph_convolution(inputs, adj, weight, bias))

    assert out_f32.shape == (B, H, N, Fout)
    assert jnp.allclose(out_f32, out_ref, atol=1e-4, rtol=1e-4)
    assert jnp.allclose(out_bf16, out_ref, atol=5e-2, rtol=5e-2)

    # second config: H*Fout = 32 -> padded to 128 lanes; also exercise the
    # tiled (non-resident) support path explicitly.
    Fin2, Fout2 = 32, 8
    inputs2 = jax.random.normal(k_x, (B, H, N, Fin2), jnp.float32)
    weight2, bias2 = init_params(k_w2, Fin2, Fout2)
    out2 = jax.block_until_ready(
        graph_convolution(inputs2, adj, weight2, bias2,
                          compute_dtype=jnp.float32, x_resident=False))
    out2_ref = _reference(inputs2, adj, weight2, bias2)
    assert out2.shape == (B, H, N, Fout2)
    assert jnp.allclose(out2, out2_ref, atol=1e-4, rtol=1e-4)

    print("KERNEL_OK")
</pallas_src>

<mosaic_0001>
module attributes {stable_mosaic.version = 11 : i64} {
  func.func @kernel(%arg0: i32, %arg1: i32, %arg2: i32, %arg3: memref<1x16x16xf32, #tpu.memory_space<vmem>>, %arg4: memref<1x16x128xf32, #tpu.memory_space<vmem>>, %arg5: memref<1x128xf32, #tpu.memory_space<vmem>>, %arg6: memref<1x16x128xf32, #tpu.memory_space<vmem>>) attributes {dimension_semantics = [#tpu.dimension_semantics<parallel>, #tpu.dimension_semantics<parallel>, #tpu.dimension_semantics<arbitrary>], iteration_bounds = array<i64: 2, 1, 1>, scalar_prefetch = 0 : i64, scratch_operands = 0 : i64, tpu.core_type = #tpu.core_type<tc>, window_params = [{transform_indices = @transform_0, window_bounds = array<i64: 1, 16, 16>}, {transform_indices = @transform_1, window_bounds = array<i64: 1, 16, 128>}, {pipeline_mode = #tpu.pipeline_mode<synchronous>, transform_indices = @transform_2, window_bounds = array<i64: 1, 128>}, {transform_indices = @transform_3, window_bounds = array<i64: 1, 16, 128>}]} {
    %c0_i32 = arith.constant 0 : i32
    %0 = arith.cmpi eq, %arg2, %c0_i32 : i32
    %1 = arith.extui %0 : i1 to i32
    %c0_i32_0 = arith.constant 0 : i32
    %2 = arith.cmpi ne, %1, %c0_i32_0 : i32
    scf.if %2 {
      %cst_13 = arith.constant 0.000000e+00 : f32
      %20 = vector.broadcast %cst_13 : f32 to vector<16x128xf32>
      %c0_14 = arith.constant 0 : index
      %c0_15 = arith.constant 0 : index
      %c0_16 = arith.constant 0 : index
      %21 = vector.load %arg6[%c0_14, %c0_15, %c0_16] : memref<1x16x128xf32, #tpu.memory_space<vmem>>, vector<1x16x128xf32>
      %22 = vector.shape_cast %21 : vector<1x16x128xf32> to vector<16x128xf32>
      %23 = vector.shape_cast %20 : vector<16x128xf32> to vector<1x16x128xf32>
      tpu.vector_store %arg6[%c0_14, %c0_15, %c0_16], %23 {strides = array<i32>} : memref<1x16x128xf32, #tpu.memory_space<vmem>>, vector<1x16x128xf32>,
    } else {
    }
    %c16_i32 = arith.constant 16 : i32
    %3 = arith.muli %arg2, %c16_i32 : i32
    %4 = tpu.assume_multiple %3, 16 : i32
    %c0 = arith.constant 0 : index
    %5 = arith.index_cast %4 : i32 to index
    %c0_1 = arith.constant 0 : index
    %6 = vector.load %arg4[%c0, %5, %c0_1] : memref<1x16x128xf32, #tpu.memory_space<vmem>>, vector<1x16x128xf32>
    %7 = vector.shape_cast %6 : vector<1x16x128xf32> to vector<16x128xf32>
    %c0_2 = arith.constant 0 : index
    %c0_3 = arith.constant 0 : index
    %c0_4 = arith.constant 0 : index
    %8 = vector.load %arg6[%c0_2, %c0_3, %c0_4] : memref<1x16x128xf32, #tpu.memory_space<vmem>>, vector<1x16x128xf32>
    %9 = vector.shape_cast %8 : vector<1x16x128xf32> to vector<16x128xf32>
    %c0_5 = arith.constant 0 : index
    %c0_6 = arith.constant 0 : index
    %c0_7 = arith.constant 0 : index
    %10 = vector.load %arg3[%c0_5, %c0_6, %c0_7] : memref<1x16x16xf32, #tpu.memory_space<vmem>>, vector<1x16x16xf32>
    %11 = vector.shape_cast %10 : vector<1x16x16xf32> to vector<16x16xf32>
    %cst = arith.constant dense<0.000000e+00> : vector<16x128xf32>
    %12 = tpu.matmul %11, %7, %cst {dimension_numbers = #tpu.dot_dimension_numbers<[1], [0], [0], [1], [0, 0, 1, 1], [], []>} : vector<16x16xf32>, vector<16x128xf32>, vector<16x128xf32> -> vector<16x128xf32>
    %13 = arith.addf %9, %12 : vector<16x128xf32>
    %c0_8 = arith.constant 0 : index
    %c0_9 = arith.constant 0 : index
    %c0_10 = arith.constant 0 : index
    %14 = vector.load %arg6[%c0_8, %c0_9, %c0_10] : memref<1x16x128xf32, #tpu.memory_space<vmem>>, vector<1x16x128xf32>
    %15 = vector.shape_cast %14 : vector<1x16x128xf32> to vector<16x128xf32>
    %16 = vector.shape_cast %13 : vector<16x128xf32> to vector<1x16x128xf32>
    tpu.vector_store %arg6[%c0_8, %c0_9, %c0_10], %16 {strides = array<i32>} : memref<1x16x128xf32, #tpu.memory_space<vmem>>, vector<1x16x128xf32>,
    %c0_i32_11 = arith.constant 0 : i32
    %17 = arith.cmpi eq, %arg2, %c0_i32_11 : i32
    %18 = arith.extui %17 : i1 to i32
    %c0_i32_12 = arith.constant 0 : i32
    %19 = arith.cmpi ne, %18, %c0_i32_12 : i32
    scf.if %19 {
      %c0_13 = arith.constant 0 : index
      %c0_14 = arith.constant 0 : index
      %c0_15 = arith.constant 0 : index
      %20 = vector.load %arg6[%c0_13, %c0_14, %c0_15] : memref<1x16x128xf32, #tpu.memory_space<vmem>>, vector<1x16x128xf32>
      %21 = vector.shape_cast %20 : vector<1x16x128xf32> to vector<16x128xf32>
      %c0_16 = arith.constant 0 : index
      %c0_17 = arith.constant 0 : index
      %22 = vector.load %arg5[%c0_16, %c0_17] : memref<1x128xf32, #tpu.memory_space<vmem>>, vector<1x128xf32>
      %23 = vector.broadcast %22 : vector<1x128xf32> to vector<16x128xf32>
      %24 = arith.addf %21, %23 : vector<16x128xf32>
      %c0_18 = arith.constant 0 : index
      %c0_19 = arith.constant 0 : index
      %c0_20 = arith.constant 0 : index
      %25 = vector.load %arg6[%c0_18, %c0_19, %c0_20] : memref<1x16x128xf32, #tpu.memory_space<vmem>>, vector<1x16x128xf32>
      %26 = vector.shape_cast %25 : vector<1x16x128xf32> to vector<16x128xf32>
      %27 = vector.shape_cast %24 : vector<16x128xf32> to vector<1x16x128xf32>
      tpu.vector_store %arg6[%c0_18, %c0_19, %c0_20], %27 {strides = array<i32>} : memref<1x16x128xf32, #tpu.memory_space<vmem>>, vector<1x16x128xf32>,
    } else {
    }
    return
  }
  func.func @transform_0(%arg0: i32, %arg1: i32, %arg2: i32) -> (i32, i32, i32) {
    %c0_i32 = arith.constant 0 : i32
    return %arg0, %arg1, %arg2 : i32, i32, i32
  }
  func.func @transform_1(%arg0: i32, %arg1: i32, %arg2: i32) -> (i32, i32, i32) {
    %c0_i32 = arith.constant 0 : i32
    %c0_i32_0 = arith.constant 0 : i32
    %c0_i32_1 = arith.constant 0 : i32
    return %arg0, %c0_i32, %c0_i32_0 : i32, i32, i32
  }
  func.func @transform_2(%arg0: i32, %arg1: i32, %arg2: i32) -> (i32, i32) {
    %c0_i32 = arith.constant 0 : i32
    %c0_i32_0 = arith.constant 0 : i32
    %c0_i32_1 = arith.constant 0 : i32
    return %c0_i32, %c0_i32_0 : i32, i32
  }
  func.func @transform_3(%arg0: i32, %arg1: i32, %arg2: i32) -> (i32, i32, i32) {
    %c0_i32 = arith.constant 0 : i32
    %c0_i32_0 = arith.constant 0 : i32
    return %arg0, %arg1, %c0_i32 : i32, i32, i32
  }
}

</mosaic_0001>

<bundles_post_ra>
// kernel: tpu_custom_call.1
= control target key start
LH: loop header
LB: loop body
LE: loop exit
PB: predicated region body
PF: predicated region fallthrough
CT: control target
= control target key end

     0   :  { %8 = vsyncpa [#allocation3], 0  ;;  %s1033_s0 = inlined_call_operand.hbm [shape: f32[2,16,16], index: 0, kind: input, shape index: {}]   ;;  %s1034_s1 = inlined_call_operand.hbm [shape: f32[2,16,128], index: 1, kind: input, shape index: {}]   ;;  %s1035_s2 = inlined_call_operand.vmem [shape: f32[1,128], index: 2, kind: input, shape index: {}]   ;;  %s1036_s3 = inlined_call_operand.hbm [shape: f32[2,16,128], index: 3, kind: output, shape index: {}]  }
   0x1   :  { %10 = vsyncpa [#allocation3 + $0x1], 0 }
   0x2   :  { %11 = vsyncpa [#allocation6], 0 }
   0x3   :  { %13 = vsyncpa [#allocation6 + $0x1], 0 }
   0x4   :  { %14 = vsyncpa [#allocation4], 0 }
   0x5   :  { %16 = vsyncpa [#allocation4 + $0x1], 0  ;;  %s794_s12 = smov 0   ;;  %s796_s13 = smov 0  }
   0x6   :  { %s798_s14 = smov 0   ;;  %s800_s15 = smov 0  }
   0x7   :  { %s802_s16 = smov 0   ;;  %s804_s17 = smov 0  }
   0x8 LB: > { %s507_s18 = sadd.s32 4294967295, %s765_s17   ;;  %s508_s19 = sadd.s32 4294967294, %s765_s17   ;;  %s765_s17 = sphi %s804_s17, %s22_s17   ;;  %s761_s16 = sphi %s802_s16, %s1054_s16   ;;  %s757_s15 = sphi %s800_s15, %s1053_s15   ;;  %s753_s14 = sphi %s798_s14, %s1052_s14   ;;  %s749_s13 = sphi %s796_s13, %s1051_s13   ;;  %s745_s12 = sphi %s794_s12, %s1050_s12  }
   0x9   : > { %s41_s20 = sadd.s32 1, %s761_s16  ;;  %s52_s21 = sadd.s32 1, %s753_s14 }
   0xa   : > { %p43_p0 = scmp.ge.s32.totalorder %s41_s20, 2  ;;  %p59_p1 = scmp.ne.s32.totalorder %s753_s14, %s749_s13 }
   0xb   : > { %p60_p2 = scmp.eq.s32.totalorder %s765_s17, 0  ;;  %p65_p3 = scmp.ne.s32.totalorder %s749_s13, %s745_s12 }
   0xc   : > { %s1056_s20 = smov (%p43_p0, %s41_s20), 0  ;;  %p66_p5 = scmp.eq.s32.totalorder %s507_s18, 0 }
   0xd   : > { %p835_p4 = por %p60_p2, %p59_p1  ;;  %s45_s23 = ssub.s32 %s761_s16, %s1056_s20 }
   0xe   : > { %p138_p6 = scmp.eq.s32.totalorder %s507_s18, 1  ;;  %p50_p7 = scmp.eq.s32.totalorder %s45_s23, 0 }
   0xf   : > { %p841_p8 = por %p66_p5, %p65_p3  ;;  %p144_p10 = scmp.eq.s32.totalorder %s508_s19, 1 }
  0x10   : > { %p845_p9 = por %p138_p6, %p59_p1  ;;  %p564_p13 = scmp.lt.s32.totalorder %s765_s17, 2 }
  0x11   : > { %s1040_s24 = scalar_select %p841_p8, 1, 0 }
  0x12   : > { %s1041_s25 = scalar_select %p845_p9, 1, 0 }
  0x13   : > { %s850_s26 = scalar_select %p50_p7, %s753_s14, %s52_s21  }
  0x14   : > { %p852_p11 = por %p144_p10, %p65_p3  ;;  %s859_s28 = sand.u32 1, %s753_s14  }
  0x15   : > { %s511_s29 = sshll.u32 %s859_s28, 4  ;;  %s529_s30 = sshll.u32 %s761_s16, 8 }
  0x16   : > { %s1042_s27 = scalar_select %p852_p11, 1, 0 }
  0x17   : > { %s868_s6 = scalar_lea.hbm %s1033_s0, %s529_s30  ;;  %s171_s7 = scalar_lea.vmem [#allocation2], %s511_s29 }
  0x18   : > { %s181_s8 = sshll.u32 %s171_s7, 4  ;;  %p876_p0 = pnand %p564_p13, %p835_p4  ;;  %s872_s8 = int_to_ptr.vmem [resolvable:$true] %s181_s8 }
  0x19   : > { %s168_s10 = scalar_lea.sflag [#allocation3], %s859_s28  ;;  %s619_s11 = scalar_lea.hbm %s868_s6, 256 }
  0x1a   : > { %p620_p2 = scmp.ne.s32.totalorder %s868_s6, %s619_s11  ;;  %p621_p3 = pneg %p876_p0 }
  0x1b   : > { %s624_s21 = scalar_lea.hbm %s1033_s0, 512  ;;  %p625_p4 = scmp.lt.u32.totalorder %s868_s6, %s1033_s0 }
  0x1c   : > { %p622_p5 = pnand %p621_p3, %p620_p2  ;;  %p626_p7 = scmp.lt.u32.totalorder %s624_s21, %s619_s11 }
  0x1d   : > { %p628_p13 = scmp.lt.u32.totalorder %s619_s11, %s868_s6 }
  0x1e   : > { %p623_p6 = pneg %p622_p5  ;;  %p627_p10 = por %p626_p7, %p625_p4 }
  0x20   : > { %p629_p12 = por %p628_p13, %p627_p10 }
  0x22   : > { %p630_p1 = pnand %p629_p12, %p623_p6 }
  0x24   : > { %633 = shalt.err (!%p630_p1)
}
  0x25   : > { %s634_s4 = scalar_lea.vmem %s872_s8, 256  ;;  %s767_s5 = smov [#allocation2]  }
  0x26   : > { %p635_p2 = scmp.ne.s32.totalorder %s872_s8, %s634_s4  ;;  %s639_s7 = sshll.u32 %s767_s5, 4  ;;  %s640_s7 = int_to_ptr.vmem [resolvable:$false] %s639_s7 }
  0x27   : > { %s641_s18 = scalar_lea.vmem %s640_s7, 512  ;;  %p642_p9 = scmp.lt.s32.totalorder %s872_s8, %s640_s7 }
  0x28   : > { %p637_p5 = pnand %p635_p2, %p621_p3  ;;  %p643_p4 = scmp.lt.s32.totalorder %s641_s18, %s634_s4 }
  0x2a   : > { %p638_p11 = pneg %p637_p5  ;;  %p644_p7 = por %p643_p4, %p642_p9 }
  0x2c   : > { %p645_p10 = pnand %p644_p7, %p638_p11 }
  0x2e   : > { %648 = shalt.err (!%p645_p10)
}
  0x2f   : > { %s768_s11 = smov 128   ;;  %s769_s19 = smov 8  }
  0x30   : > { %556 = dma.hbm_to_vmem [thread:$0]  (!%p876_p0), %s868_s6, 256, %s872_s8, %s168_s10, %s768_s11, %s768_s11, %s769_s19  }
  0x31   : > { %p210_p9 = scmp.lt.s32.totalorder %s765_s17, 3  ;;  %s918_s23 = scalar_lea.hbm %s1034_s1, %s529_s30 }
  0x32   : > { %p1044_p11 = scmp.ge.s32.totalorder %s765_s17, 1  ;;  %s195_s5 = scalar_lea.vmem [#allocation5], %s511_s29 }
  0x33   : > { %s202_s7 = sshll.u32 %s195_s5, 4  ;;  %s192_s6 = scalar_lea.sflag [#allocation6], %s859_s28  ;;  %s928_s7 = int_to_ptr.vmem [resolvable:$true] %s202_s7 }
  0x34   : > { %p922_p12 = pnand %p1044_p11, %p210_p9  ;;  %s649_s8 = scalar_lea.hbm %s918_s23, 256 }
  0x35   : > { %p650_p1 = scmp.ne.s32.totalorder %s918_s23, %s649_s8  ;;  %s654_s18 = scalar_lea.hbm %s1034_s1, 512 }
  0x36   : > { %p655_p2 = scmp.lt.u32.totalorder %s918_s23, %s1034_s1  ;;  %p656_p5 = scmp.lt.u32.totalorder %s654_s18, %s649_s8 }
  0x37   : > { %p652_p6 = pnand %p650_p1, %p621_p3  ;;  %p658_p7 = scmp.lt.u32.totalorder %s649_s8, %s918_s23 }
  0x38   : > { %p657_p4 = por %p656_p5, %p655_p2 }
  0x39   : > { %p653_p13 = pneg %p652_p6 }
  0x3a   : > { %p659_p10 = por %p658_p7, %p657_p4 }
  0x3c   : > { %p660_p9 = pnand %p659_p10, %p653_p13 }
  0x3e   : > { %663 = shalt.err (!%p660_p9)
}
  0x3f   : > { %s664_s29 = scalar_lea.vmem %s928_s7, 256  ;;  %s770_s5 = smov [#allocation5]  }
  0x40   : > { %p665_p11 = scmp.ne.s32.totalorder %s928_s7, %s664_s29  ;;  %s669_s30 = sshll.u32 %s770_s5, 4  ;;  %s670_s30 = int_to_ptr.vmem [resolvable:$false] %s669_s30 }
  0x41   : > { %s671_s10 = scalar_lea.vmem %s670_s30, 512  ;;  %p672_p8 = scmp.lt.s32.totalorder %s928_s7, %s670_s30 }
  0x42   : > { %p667_p1 = pnand %p665_p11, %p621_p3  ;;  %p673_p2 = scmp.lt.s32.totalorder %s671_s10, %s664_s29 }
  0x44   : > { %p668_p6 = pneg %p667_p1  ;;  %p674_p5 = por %p673_p2, %p672_p8 }
  0x46   : > { %p675_p4 = pnand %p674_p5, %p668_p6 }
  0x48   : > { %678 = shalt.err (!%p675_p4)
}
  0x49   : > { %559 = dma.hbm_to_vmem [thread:$0]  (!%p876_p0), %s918_s23, 256, %s928_s7, %s192_s6, %s768_s11, %s768_s11, %s769_s19  }
  0x4a   : > { %214 = sbr.rel (%p922_p12) target bundleno = 321 (0x141), region = 32  ;;  %s962_s8 = sand.u32 (!%p922_p12), 1, %s749_s13  }
  0x4b   : > { %s518_s18 = sshll.u32 (!%p922_p12), %s962_s8, 4  ;;  %s217_s21 = scalar_lea.sflag (!%p922_p12), [#allocation3], %s962_s8 }
  0x4c   : > { %s220_s9 = scalar_lea.vmem (!%p922_p12), [#allocation2], %s518_s18  ;;  %p1046_p8 = scmp.ne.s32.totalorder (!%p922_p12), %s1040_s24, 0 }
  0x51   : > { %732 = dma.done.wait (%p1046_p8), %s217_s21, 256  }
  0x52   : > { %734 = vsyncadd (%p1046_p8), %s217_s21, 4294967040  ;;  %s226_s28 = scalar_lea.sflag [#allocation6], %s962_s8  ;;  %s229_s11 = scalar_lea.vmem [#allocation5], %s518_s18 }
  0x53   : > { %736 = dma.done.wait (%p1046_p8), %s226_s28, 256  }
  0x54   : > { %738 = vsyncadd (%p1046_p8), %s226_s28, 4294967040  ;;  %vm273_vm0 = vcmask 130048   ;;  %v267_v0 = vld [vmem:[%s229_s11] sm:$0xff]  ;;  %v268_v1 = vld [vmem:[%s229_s11 + $0x8] sm:$0xff]  ;;  %s531_s24 = sshll.u32 %s757_s15, 8  ;;  %s256_s4 = scalar_lea.vmem [#allocation7], %s518_s18 }
  0x55   : > { %v271_v2 = vld [vmem:[%s220_s9] sm:$0xff]  ;;  %v543_v3 = vpack.c.bf16 %v268_v1, %v267_v0  ;;  %v272_v4 = vld [vmem:[%s220_s9 + $0x8] sm:$0xff]  ;;  %s391_s7 = sshll.u32 %s256_s4, 4  ;;  %s982_s29 = scalar_lea.hbm %s1036_s3, %s531_s24  ;;  %s984_s7 = int_to_ptr.vmem [resolvable:$true] %s391_s7 }
  0x56   : > { %540 = vmatprep.mubr.msk.f32.mxu0 %vm273_vm0, %v271_v2  ;;  %v523_v6 = vld [vmem:[%s1035_s2] ss:$0 sm:$0xff]  ;;  %s376_s5 = scalar_lea.sflag [#allocation4], %s962_s8  ;;  %s679_s30 = scalar_lea.vmem %s984_s7, 256 }
  0x57   : > { %544 = vmatprep.subr.bf16.mxu0 %v543_v3  ;;  %p680_p0 = scmp.ne.s32.totalorder %s984_s7, %s679_s30  ;;  %p1047_p3 = scmp.ne.s32.totalorder %s1041_s25, 0 }
  0x58   : > { %546 = vmatpush3.bf16.msra.mxu0 %v543_v3  ;;  %s771_s15 = smov [#allocation7]  }
  0x59   : > { %p681_p12 = pnand %p680_p0, %p1047_p3  ;;  %s683_s10 = sshll.u32 %s771_s15, 4  ;;  %s684_s10 = int_to_ptr.vmem [resolvable:$false] %s683_s10 }
  0x5a   : > { %s685_s18 = scalar_lea.vmem %s684_s10, 512  ;;  %p686_p7 = scmp.lt.s32.totalorder %s984_s7, %s684_s10 }
  0x5b   : > { %541 = vmatmul.mubr.msk.f32.vlgmr.msra.gmra.mrb[0].mxu0 %vm273_vm0, %v272_v4  ;;  %p682_p13 = pneg %p681_p12  ;;  %p687_p10 = scmp.lt.s32.totalorder %s685_s18, %s679_s30 }
  0x5d   : > { %p688_p9 = por %p687_p10, %p686_p7 }
  0x5f   : > { %p689_p11 = pnand %p688_p9, %p682_p13 }
 0x12e   : > { %v542_v5 = vpop.f32.mrb[0].mxu0 }
 0x12f   : > { %v346_v7 = vpop.f32.mrb[1].mxu0  ;;  %v372_v8 = vadd.f32 %v542_v5, %v523_v6 }
 0x130   : > { %v371_v9 = vadd.f32 %v523_v6, %v346_v7 }
 0x131   : > { %374 = vst [vmem:[%s256_s4 + $0x8] sm:$0xff] %v372_v8 }
 0x132   : > { %373 = vst [vmem:[%s256_s4] sm:$0xff] %v371_v9 }
 0x133   : > { %692 = shalt.err (!%p689_p11)
}
 0x134   : > { %s693_s21 = scalar_lea.hbm %s982_s29, 256  ;;  %s697_s11 = scalar_lea.hbm %s1036_s3, 512 }
 0x135   : > { %p694_p1 = scmp.ne.s32.totalorder %s982_s29, %s693_s21  ;;  %p698_p5 = scmp.lt.u32.totalorder %s982_s29, %s1036_s3 }
 0x136   : > { %p699_p4 = scmp.lt.u32.totalorder %s697_s11, %s693_s21  ;;  %p701_p0 = scmp.lt.u32.totalorder %s693_s21, %s982_s29 }
 0x137   : > { %p695_p6 = pnand %p694_p1, %p1047_p3 }
 0x138   : > { %p700_p8 = por %p699_p4, %p698_p5 }
 0x139   : > { %p696_p2 = pneg %p695_p6 }
 0x13a   : > { %p702_p12 = por %p701_p0, %p700_p8 }
 0x13c   : > { %p703_p13 = pnand %p702_p12, %p696_p2 }
 0x13e   : > { %706 = shalt.err (!%p703_p13)
}
 0x13f   : > { %s772_s24 = smov 128   ;;  %s773_s4 = smov 8  }
 0x140   : > { %551 = dma.vmem_to_hbm [thread:$0]  (%p1047_p3), %s984_s7, 256, %s982_s29, %s376_s5, %s772_s24, %s772_s24, %s773_s4  }
 0x141 PF: > { %s406_s6 = sand.u32 1, %s745_s12   ;;  %p1048_p7 = scmp.ne.s32.totalorder %s1042_s27, 0 }
 0x142   : > { %p1049_p10 = scmp.ge.s32.totalorder %s765_s17, 2  ;;  %s407_s22 = scalar_lea.sflag [#allocation4], %s406_s6 }
 0x144   : > { %p561_p9 = pnand %p1049_p10, %p1048_p7 }
 0x146   : > { %740 = dma.done.wait (!%p561_p9), %s407_s22, 256  }
 0x147   : > { %742 = vsyncadd (!%p561_p9), %s407_s22, 4294967040  ;;  %s22_s17 = sadd.s32 1, %s765_s17   ;;  %s1050_s12 = smov %s749_s13 }
 0x148   : > { %p19_p11 = scmp.ge.s32.totalorder %s22_s17, 4   ;;  %s1051_s13 = smov %s753_s14 }
 0x149   : > { %s1052_s14 = smov %s850_s26  ;;  %s1053_s15 = smov %s761_s16 }
 0x14a   : > { %s1054_s16 = smov %s1056_s20  ;;  %21 = sbr.rel (!%p19_p11) target bundleno = 8 (0x8), region = 99 }
 0x151   :  { %412 = vsyncpa [#allocation3], 1 }
 0x152   :  { %414 = vsyncpa [#allocation3 + $0x1], 1 }
 0x153   :  { %415 = vsyncpa [#allocation6], 1 }
 0x154   :  { %417 = vsyncpa [#allocation6 + $0x1], 1 }
 0x155   :  { %418 = vsyncpa [#allocation4], 1 }
 0x156   :  { %420 = vsyncpa [#allocation4 + $0x1], 1 }

</bundles_post_ra>
